<compile_context>
chip_gen: v7x
topology: tpu7x:2x2x1
jax: 0.10.0
libtpu: 0.0.40
codegen_flags: <defaults>
</compile_context>

<pallas_src>
import jax
import jax.numpy as jnp
from jax import lax
from jax.experimental import pallas as pl
from jax.experimental.pallas import tpu as pltpu


def channel_module_kernel(scal_ref, x_ref, o_ref):
    # scal_ref: SMEM (3,) = [w1.w2, b1.w2, gamma]
    # x_ref / o_ref: (Bt, H, W) VMEM blocks.
    s_ww = scal_ref[0]
    s_bw = scal_ref[1]
    gamma = scal_ref[2]
    bt = x_ref.shape[0]

    def body(b, carry):
        xb = x_ref[b].astype(jnp.float32)                             # (H, W)

        # energy[i, j] = s_ww * sum_h x[h,i]*x[h,j] + s_bw * sum_h x[h,j]
        # (row-constant bias terms cancel under the row-wise min-max
        #  normalization below and are omitted).
        gram = lax.dot_general(xb, xb, (((0,), (0,)), ((), ())),
                               preferred_element_type=jnp.float32)    # (W, W)
        colsum = jnp.sum(xb, axis=0, keepdims=True)                   # (1, W)
        energy = s_ww * gram + s_bw * colsum                          # (W, W)

        # Fused min-max normalization + softmax over the last dim.
        e_max = jnp.max(energy, axis=1, keepdims=True)
        e_min = jnp.min(energy, axis=1, keepdims=True)
        inv_range = 1.0 / (e_max - e_min + 1e-8)
        p = jnp.exp((energy - e_max) * inv_range)                     # exps <= 0, stable
        att = p * (1.0 / jnp.sum(p, axis=1, keepdims=True))           # (W, W)

        # out[h, j] = gamma * sum_i x[h, i] * att[j, i] + x[h, j]   (== x @ att^T)
        out = lax.dot_general(xb, att, (((1,), (1,)), ((), ())),
                              preferred_element_type=jnp.float32)     # (H, W)
        o_ref[b] = (gamma * out + xb).astype(o_ref.dtype)
        return carry

    lax.fori_loop(0, bt, body, None, unroll=True)


def _pick_batch_tile(B, max_bt=32):
    """Largest divisor of B that is <= max_bt and (when possible) leaves >= 2
    grid steps, so v7x's second TensorCore is not left idle."""
    best = 1
    for bt in range(1, min(B, max_bt) + 1):
        if B % bt == 0 and (B // bt >= 2 or B == 1):
            best = bt
    return best


def channel_module(x, w1, b1, w2, b2, gamma):
    """x: (B, C, H, W) NCHW, C must be 1 (see module reshape). Returns same shape/dtype."""
    B, C, H, W = x.shape
    assert C == 1, "Channel_Module forward only works for in_dim == 1"
    x3 = x.reshape(B, H, W)

    # Collapse the two 8-channel 1x1 convs into two scalars (see kernel comment);
    # gamma rides along in the same SMEM vector.
    scalars = jnp.stack([jnp.dot(w1, w2), jnp.dot(b1, w2), gamma[0]]).astype(jnp.float32)

    bt = _pick_batch_tile(B)
    grid = (B // bt,)

    flops = 4 * B * H * W * W          # two contractions per plane (gram + x@att^T)
    transcendentals = B * W * W        # exp
    bytes_accessed = 2 * B * H * W * x.dtype.itemsize + scalars.size * 4

    out = pl.pallas_call(
        channel_module_kernel,
        out_shape=jax.ShapeDtypeStruct((B, H, W), x.dtype),
        grid=grid,
        in_specs=[
            pl.BlockSpec(memory_space=pltpu.MemorySpace.SMEM),        # scalars (3,)
            pl.BlockSpec((bt, H, W), lambda i: (i, 0, 0)),            # x
        ],
        out_specs=pl.BlockSpec((bt, H, W), lambda i: (i, 0, 0)),
        compiler_params=pltpu.CompilerParams(
            dimension_semantics=("parallel",)),
        cost_estimate=pl.CostEstimate(
            flops=flops, transcendentals=transcendentals,
            bytes_accessed=bytes_accessed),
    )(scalars, x3)

    return out.reshape(B, C, H, W)


def channel_module_ref(x, w1, b1, w2, b2, gamma):
    """Pure-JAX transcription of the PyTorch forward (C == 1), full conv path."""
    B, C, H, W = x.shape
    x0 = x[:, 0]                                                           # (B, H, W)
    c1 = x0[:, None] * w1[None, :, None, None] + b1[None, :, None, None]   # (B,8,H,W)
    c2 = x0[:, None] * w2[None, :, None, None] + b2[None, :, None, None]
    q = jnp.transpose(c1, (0, 3, 1, 2)).reshape(B, W, 8 * H)
    k = c2.reshape(B, 8 * H, W)
    energy = jnp.matmul(q, k)
    e_max = energy.max(axis=2, keepdims=True)
    e_min = energy.min(axis=2, keepdims=True)
    energy = (energy - e_min) / (e_max - e_min + 1e-8)
    att = jax.nn.softmax(energy, axis=2).reshape(B, 1, W, W)
    out = jnp.matmul(x, jnp.transpose(att, (0, 1, 3, 2)))
    return gamma[0] * out + x


if __name__ == "__main__":
    B, C, H, W = 8, 1, 16, 16      # in_dim = C = 1 (required by the module's reshape)
    key = jax.random.PRNGKey(0)
    kx, k1, kb1, k2, kb2 = jax.random.split(key, 5)

    x = jax.random.normal(kx, (B, C, H, W), dtype=jnp.float32)
    # Conv2d(1, 8, kernel_size=(1,1)) -> weight (8,1,1,1), bias (8,); flattened here.
    w1 = jax.random.normal(k1, (8,), dtype=jnp.float32) * 0.5
    b1 = jax.random.normal(kb1, (8,), dtype=jnp.float32) * 0.1
    w2 = jax.random.normal(k2, (8,), dtype=jnp.float32) * 0.5
    b2 = jax.random.normal(kb2, (8,), dtype=jnp.float32) * 0.1
    # Module inits gamma to 0 (making out == x); use a nonzero deterministic
    # value so the attention path is actually exercised.
    gamma = jnp.array([0.5], dtype=jnp.float32)

    out = channel_module(x, w1, b1, w2, b2, gamma)
    out = jax.block_until_ready(out)

    ref = channel_module_ref(x, w1, b1, w2, b2, gamma)
    assert out.shape == (B, C, H, W)
    assert out.dtype == x.dtype
    assert jnp.allclose(out, ref, atol=1e-4, rtol=1e-4), (
        f"max abs err {jnp.max(jnp.abs(out - ref))}")
    print("KERNEL_OK")
</pallas_src>

<mosaic_0001>
module attributes {stable_mosaic.version = 11 : i64} {
  func.func @channel_module_kernel(%arg0: i32, %arg1: memref<3xf32, #tpu.memory_space<smem>>, %arg2: memref<4x16x16xf32, #tpu.memory_space<vmem>>, %arg3: memref<4x16x16xf32, #tpu.memory_space<vmem>>) attributes {dimension_semantics = [#tpu.dimension_semantics<parallel>], iteration_bounds = array<i64: 2>, scalar_prefetch = 0 : i64, scratch_operands = 0 : i64, tpu.core_type = #tpu.core_type<tc>, window_params = [{transform_indices = @transform_0, window_bounds = array<i64: 3>}, {transform_indices = @transform_1, window_bounds = array<i64: 4, 16, 16>}, {transform_indices = @transform_2, window_bounds = array<i64: 4, 16, 16>}]} {
    %c0 = arith.constant 0 : index
    %0 = memref.load %arg1[%c0] : memref<3xf32, #tpu.memory_space<smem>>
    %c1 = arith.constant 1 : index
    %1 = memref.load %arg1[%c1] : memref<3xf32, #tpu.memory_space<smem>>
    %c2 = arith.constant 2 : index
    %2 = memref.load %arg1[%c2] : memref<3xf32, #tpu.memory_space<smem>>
    %c0_i32 = arith.constant 0 : i32
    %3 = arith.index_cast %c0_i32 : i32 to index
    %c0_0 = arith.constant 0 : index
    %c0_1 = arith.constant 0 : index
    %4 = vector.load %arg2[%3, %c0_0, %c0_1] : memref<4x16x16xf32, #tpu.memory_space<vmem>>, vector<1x16x16xf32>
    %5 = vector.shape_cast %4 : vector<1x16x16xf32> to vector<16x16xf32>
    %cst = arith.constant dense<0.000000e+00> : vector<16x16xf32>
    %6 = tpu.matmul %5, %5, %cst {dimension_numbers = #tpu.dot_dimension_numbers<[0], [0], [1], [1], [0, 1, 1, 1], [], []>} : vector<16x16xf32>, vector<16x16xf32>, vector<16x16xf32> -> vector<16x16xf32>
    %cst_2 = arith.constant dense<0.000000e+00> : vector<16xf32>
    %7 = vector.multi_reduction <add>, %5, %cst_2 [0] : vector<16x16xf32> to vector<16xf32>
    %8 = vector.shape_cast %7 : vector<16xf32> to vector<1x16xf32>
    %9 = vector.broadcast %0 : f32 to vector<16x16xf32>
    %10 = arith.mulf %9, %6 : vector<16x16xf32>
    %11 = vector.broadcast %1 : f32 to vector<1x16xf32>
    %12 = arith.mulf %11, %8 : vector<1x16xf32>
    %13 = vector.broadcast %12 : vector<1x16xf32> to vector<16x16xf32>
    %14 = arith.addf %10, %13 : vector<16x16xf32>
    %cst_3 = arith.constant dense<0xFF800000> : vector<16xf32>
    %15 = vector.multi_reduction <maximumf>, %14, %cst_3 [1] : vector<16x16xf32> to vector<16xf32>
    %16 = vector.shape_cast %15 : vector<16xf32> to vector<16x1xf32>
    %cst_4 = arith.constant dense<0x7F800000> : vector<16xf32>
    %17 = vector.multi_reduction <minimumf>, %14, %cst_4 [1] : vector<16x16xf32> to vector<16xf32>
    %18 = vector.shape_cast %17 : vector<16xf32> to vector<16x1xf32>
    %19 = arith.subf %16, %18 : vector<16x1xf32>
    %cst_5 = arith.constant 9.99999993E-9 : f32
    %20 = vector.broadcast %cst_5 : f32 to vector<16x1xf32>
    %21 = arith.addf %19, %20 : vector<16x1xf32>
    %cst_6 = arith.constant 1.000000e+00 : f32
    %22 = vector.broadcast %cst_6 : f32 to vector<16x1xf32>
    %23 = arith.divf %22, %21 : vector<16x1xf32>
    %24 = vector.broadcast %16 : vector<16x1xf32> to vector<16x16xf32>
    %25 = arith.subf %14, %24 : vector<16x16xf32>
    %26 = vector.broadcast %23 : vector<16x1xf32> to vector<16x16xf32>
    %27 = arith.mulf %25, %26 : vector<16x16xf32>
    %28 = math.exp %27 : vector<16x16xf32>
    %cst_7 = arith.constant dense<0.000000e+00> : vector<16xf32>
    %29 = vector.multi_reduction <add>, %28, %cst_7 [1] : vector<16x16xf32> to vector<16xf32>
    %30 = vector.shape_cast %29 : vector<16xf32> to vector<16x1xf32>
    %cst_8 = arith.constant 1.000000e+00 : f32
    %31 = vector.broadcast %cst_8 : f32 to vector<16x1xf32>
    %32 = arith.divf %31, %30 : vector<16x1xf32>
    %33 = vector.broadcast %32 : vector<16x1xf32> to vector<16x16xf32>
    %34 = arith.mulf %28, %33 : vector<16x16xf32>
    %cst_9 = arith.constant dense<0.000000e+00> : vector<16x16xf32>
    %35 = tpu.matmul %5, %34, %cst_9 {dimension_numbers = #tpu.dot_dimension_numbers<[1], [1], [0], [0], [0, 0, 1, 0], [], []>} : vector<16x16xf32>, vector<16x16xf32>, vector<16x16xf32> -> vector<16x16xf32>
    %36 = vector.broadcast %2 : f32 to vector<16x16xf32>
    %37 = arith.mulf %36, %35 : vector<16x16xf32>
    %38 = arith.addf %37, %5 : vector<16x16xf32>
    %39 = arith.index_cast %c0_i32 : i32 to index
    %c0_10 = arith.constant 0 : index
    %c0_11 = arith.constant 0 : index
    %40 = vector.load %arg3[%39, %c0_10, %c0_11] : memref<4x16x16xf32, #tpu.memory_space<vmem>>, vector<1x16x16xf32>
    %41 = vector.shape_cast %40 : vector<1x16x16xf32> to vector<16x16xf32>
    %42 = vector.shape_cast %38 : vector<16x16xf32> to vector<1x16x16xf32>
    tpu.vector_store %arg3[%39, %c0_10, %c0_11], %42 {strides = array<i32>} : memref<4x16x16xf32, #tpu.memory_space<vmem>>, vector<1x16x16xf32>,
    %c1_i32 = arith.constant 1 : i32
    %43 = arith.index_cast %c1_i32 : i32 to index
    %c0_12 = arith.constant 0 : index
    %c0_13 = arith.constant 0 : index
    %44 = vector.load %arg2[%43, %c0_12, %c0_13] : memref<4x16x16xf32, #tpu.memory_space<vmem>>, vector<1x16x16xf32>
    %45 = vector.shape_cast %44 : vector<1x16x16xf32> to vector<16x16xf32>
    %cst_14 = arith.constant dense<0.000000e+00> : vector<16x16xf32>
    %46 = tpu.matmul %45, %45, %cst_14 {dimension_numbers = #tpu.dot_dimension_numbers<[0], [0], [1], [1], [0, 1, 1, 1], [], []>} : vector<16x16xf32>, vector<16x16xf32>, vector<16x16xf32> -> vector<16x16xf32>
    %cst_15 = arith.constant dense<0.000000e+00> : vector<16xf32>
    %47 = vector.multi_reduction <add>, %45, %cst_15 [0] : vector<16x16xf32> to vector<16xf32>
    %48 = vector.shape_cast %47 : vector<16xf32> to vector<1x16xf32>
    %49 = vector.broadcast %0 : f32 to vector<16x16xf32>
    %50 = arith.mulf %49, %46 : vector<16x16xf32>
    %51 = vector.broadcast %1 : f32 to vector<1x16xf32>
    %52 = arith.mulf %51, %48 : vector<1x16xf32>
    %53 = vector.broadcast %52 : vector<1x16xf32> to vector<16x16xf32>
    %54 = arith.addf %50, %53 : vector<16x16xf32>
    %cst_16 = arith.constant dense<0xFF800000> : vector<16xf32>
    %55 = vector.multi_reduction <maximumf>, %54, %cst_16 [1] : vector<16x16xf32> to vector<16xf32>
    %56 = vector.shape_cast %55 : vector<16xf32> to vector<16x1xf32>
    %cst_17 = arith.constant dense<0x7F800000> : vector<16xf32>
    %57 = vector.multi_reduction <minimumf>, %54, %cst_17 [1] : vector<16x16xf32> to vector<16xf32>
    %58 = vector.shape_cast %57 : vector<16xf32> to vector<16x1xf32>
    %59 = arith.subf %56, %58 : vector<16x1xf32>
    %cst_18 = arith.constant 9.99999993E-9 : f32
    %60 = vector.broadcast %cst_18 : f32 to vector<16x1xf32>
    %61 = arith.addf %59, %60 : vector<16x1xf32>
    %cst_19 = arith.constant 1.000000e+00 : f32
    %62 = vector.broadcast %cst_19 : f32 to vector<16x1xf32>
    %63 = arith.divf %62, %61 : vector<16x1xf32>
    %64 = vector.broadcast %56 : vector<16x1xf32> to vector<16x16xf32>
    %65 = arith.subf %54, %64 : vector<16x16xf32>
    %66 = vector.broadcast %63 : vector<16x1xf32> to vector<16x16xf32>
    %67 = arith.mulf %65, %66 : vector<16x16xf32>
    %68 = math.exp %67 : vector<16x16xf32>
    %cst_20 = arith.constant dense<0.000000e+00> : vector<16xf32>
    %69 = vector.multi_reduction <add>, %68, %cst_20 [1] : vector<16x16xf32> to vector<16xf32>
    %70 = vector.shape_cast %69 : vector<16xf32> to vector<16x1xf32>
    %cst_21 = arith.constant 1.000000e+00 : f32
    %71 = vector.broadcast %cst_21 : f32 to vector<16x1xf32>
    %72 = arith.divf %71, %70 : vector<16x1xf32>
    %73 = vector.broadcast %72 : vector<16x1xf32> to vector<16x16xf32>
    %74 = arith.mulf %68, %73 : vector<16x16xf32>
    %cst_22 = arith.constant dense<0.000000e+00> : vector<16x16xf32>
    %75 = tpu.matmul %45, %74, %cst_22 {dimension_numbers = #tpu.dot_dimension_numbers<[1], [1], [0], [0], [0, 0, 1, 0], [], []>} : vector<16x16xf32>, vector<16x16xf32>, vector<16x16xf32> -> vector<16x16xf32>
    %76 = vector.broadcast %2 : f32 to vector<16x16xf32>
    %77 = arith.mulf %76, %75 : vector<16x16xf32>
    %78 = arith.addf %77, %45 : vector<16x16xf32>
    %79 = arith.index_cast %c1_i32 : i32 to index
    %c0_23 = arith.constant 0 : index
    %c0_24 = arith.constant 0 : index
    %80 = vector.load %arg3[%79, %c0_23, %c0_24] : memref<4x16x16xf32, #tpu.memory_space<vmem>>, vector<1x16x16xf32>
    %81 = vector.shape_cast %80 : vector<1x16x16xf32> to vector<16x16xf32>
    %82 = vector.shape_cast %78 : vector<16x16xf32> to vector<1x16x16xf32>
    tpu.vector_store %arg3[%79, %c0_23, %c0_24], %82 {strides = array<i32>} : memref<4x16x16xf32, #tpu.memory_space<vmem>>, vector<1x16x16xf32>,
    %c2_i32 = arith.constant 2 : i32
    %83 = arith.index_cast %c2_i32 : i32 to index
    %c0_25 = arith.constant 0 : index
    %c0_26 = arith.constant 0 : index
    %84 = vector.load %arg2[%83, %c0_25, %c0_26] : memref<4x16x16xf32, #tpu.memory_space<vmem>>, vector<1x16x16xf32>
    %85 = vector.shape_cast %84 : vector<1x16x16xf32> to vector<16x16xf32>
    %cst_27 = arith.constant dense<0.000000e+00> : vector<16x16xf32>
    %86 = tpu.matmul %85, %85, %cst_27 {dimension_numbers = #tpu.dot_dimension_numbers<[0], [0], [1], [1], [0, 1, 1, 1], [], []>} : vector<16x16xf32>, vector<16x16xf32>, vector<16x16xf32> -> vector<16x16xf32>
    %cst_28 = arith.constant dense<0.000000e+00> : vector<16xf32>
    %87 = vector.multi_reduction <add>, %85, %cst_28 [0] : vector<16x16xf32> to vector<16xf32>
    %88 = vector.shape_cast %87 : vector<16xf32> to vector<1x16xf32>
    %89 = vector.broadcast %0 : f32 to vector<16x16xf32>
    %90 = arith.mulf %89, %86 : vector<16x16xf32>
    %91 = vector.broadcast %1 : f32 to vector<1x16xf32>
    %92 = arith.mulf %91, %88 : vector<1x16xf32>
    %93 = vector.broadcast %92 : vector<1x16xf32> to vector<16x16xf32>
    %94 = arith.addf %90, %93 : vector<16x16xf32>
    %cst_29 = arith.constant dense<0xFF800000> : vector<16xf32>
    %95 = vector.multi_reduction <maximumf>, %94, %cst_29 [1] : vector<16x16xf32> to vector<16xf32>
    %96 = vector.shape_cast %95 : vector<16xf32> to vector<16x1xf32>
    %cst_30 = arith.constant dense<0x7F800000> : vector<16xf32>
    %97 = vector.multi_reduction <minimumf>, %94, %cst_30 [1] : vector<16x16xf32> to vector<16xf32>
    %98 = vector.shape_cast %97 : vector<16xf32> to vector<16x1xf32>
    %99 = arith.subf %96, %98 : vector<16x1xf32>
    %cst_31 = arith.constant 9.99999993E-9 : f32
    %100 = vector.broadcast %cst_31 : f32 to vector<16x1xf32>
    %101 = arith.addf %99, %100 : vector<16x1xf32>
    %cst_32 = arith.constant 1.000000e+00 : f32
    %102 = vector.broadcast %cst_32 : f32 to vector<16x1xf32>
    %103 = arith.divf %102, %101 : vector<16x1xf32>
    %104 = vector.broadcast %96 : vector<16x1xf32> to vector<16x16xf32>
    %105 = arith.subf %94, %104 : vector<16x16xf32>
    %106 = vector.broadcast %103 : vector<16x1xf32> to vector<16x16xf32>
    %107 = arith.mulf %105, %106 : vector<16x16xf32>
    %108 = math.exp %107 : vector<16x16xf32>
    %cst_33 = arith.constant dense<0.000000e+00> : vector<16xf32>
    %109 = vector.multi_reduction <add>, %108, %cst_33 [1] : vector<16x16xf32> to vector<16xf32>
    %110 = vector.shape_cast %109 : vector<16xf32> to vector<16x1xf32>
    %cst_34 = arith.constant 1.000000e+00 : f32
    %111 = vector.broadcast %cst_34 : f32 to vector<16x1xf32>
    %112 = arith.divf %111, %110 : vector<16x1xf32>
    %113 = vector.broadcast %112 : vector<16x1xf32> to vector<16x16xf32>
    %114 = arith.mulf %108, %113 : vector<16x16xf32>
    %cst_35 = arith.constant dense<0.000000e+00> : vector<16x16xf32>
    %115 = tpu.matmul %85, %114, %cst_35 {dimension_numbers = #tpu.dot_dimension_numbers<[1], [1], [0], [0], [0, 0, 1, 0], [], []>} : vector<16x16xf32>, vector<16x16xf32>, vector<16x16xf32> -> vector<16x16xf32>
    %116 = vector.broadcast %2 : f32 to vector<16x16xf32>
    %117 = arith.mulf %116, %115 : vector<16x16xf32>
    %118 = arith.addf %117, %85 : vector<16x16xf32>
    %119 = arith.index_cast %c2_i32 : i32 to index
    %c0_36 = arith.constant 0 : index
    %c0_37 = arith.constant 0 : index
    %120 = vector.load %arg3[%119, %c0_36, %c0_37] : memref<4x16x16xf32, #tpu.memory_space<vmem>>, vector<1x16x16xf32>
    %121 = vector.shape_cast %120 : vector<1x16x16xf32> to vector<16x16xf32>
    %122 = vector.shape_cast %118 : vector<16x16xf32> to vector<1x16x16xf32>
    tpu.vector_store %arg3[%119, %c0_36, %c0_37], %122 {strides = array<i32>} : memref<4x16x16xf32, #tpu.memory_space<vmem>>, vector<1x16x16xf32>,
    %c3_i32 = arith.constant 3 : i32
    %123 = arith.index_cast %c3_i32 : i32 to index
    %c0_38 = arith.constant 0 : index
    %c0_39 = arith.constant 0 : index
    %124 = vector.load %arg2[%123, %c0_38, %c0_39] : memref<4x16x16xf32, #tpu.memory_space<vmem>>, vector<1x16x16xf32>
    %125 = vector.shape_cast %124 : vector<1x16x16xf32> to vector<16x16xf32>
    %cst_40 = arith.constant dense<0.000000e+00> : vector<16x16xf32>
    %126 = tpu.matmul %125, %125, %cst_40 {dimension_numbers = #tpu.dot_dimension_numbers<[0], [0], [1], [1], [0, 1, 1, 1], [], []>} : vector<16x16xf32>, vector<16x16xf32>, vector<16x16xf32> -> vector<16x16xf32>
    %cst_41 = arith.constant dense<0.000000e+00> : vector<16xf32>
    %127 = vector.multi_reduction <add>, %125, %cst_41 [0] : vector<16x16xf32> to vector<16xf32>
    %128 = vector.shape_cast %127 : vector<16xf32> to vector<1x16xf32>
    %129 = vector.broadcast %0 : f32 to vector<16x16xf32>
    %130 = arith.mulf %129, %126 : vector<16x16xf32>
    %131 = vector.broadcast %1 : f32 to vector<1x16xf32>
    %132 = arith.mulf %131, %128 : vector<1x16xf32>
    %133 = vector.broadcast %132 : vector<1x16xf32> to vector<16x16xf32>
    %134 = arith.addf %130, %133 : vector<16x16xf32>
    %cst_42 = arith.constant dense<0xFF800000> : vector<16xf32>
    %135 = vector.multi_reduction <maximumf>, %134, %cst_42 [1] : vector<16x16xf32> to vector<16xf32>
    %136 = vector.shape_cast %135 : vector<16xf32> to vector<16x1xf32>
    %cst_43 = arith.constant dense<0x7F800000> : vector<16xf32>
    %137 = vector.multi_reduction <minimumf>, %134, %cst_43 [1] : vector<16x16xf32> to vector<16xf32>
    %138 = vector.shape_cast %137 : vector<16xf32> to vector<16x1xf32>
    %139 = arith.subf %136, %138 : vector<16x1xf32>
    %cst_44 = arith.constant 9.99999993E-9 : f32
    %140 = vector.broadcast %cst_44 : f32 to vector<16x1xf32>
    %141 = arith.addf %139, %140 : vector<16x1xf32>
    %cst_45 = arith.constant 1.000000e+00 : f32
    %142 = vector.broadcast %cst_45 : f32 to vector<16x1xf32>
    %143 = arith.divf %142, %141 : vector<16x1xf32>
    %144 = vector.broadcast %136 : vector<16x1xf32> to vector<16x16xf32>
    %145 = arith.subf %134, %144 : vector<16x16xf32>
    %146 = vector.broadcast %143 : vector<16x1xf32> to vector<16x16xf32>
    %147 = arith.mulf %145, %146 : vector<16x16xf32>
    %148 = math.exp %147 : vector<16x16xf32>
    %cst_46 = arith.constant dense<0.000000e+00> : vector<16xf32>
    %149 = vector.multi_reduction <add>, %148, %cst_46 [1] : vector<16x16xf32> to vector<16xf32>
    %150 = vector.shape_cast %149 : vector<16xf32> to vector<16x1xf32>
    %cst_47 = arith.constant 1.000000e+00 : f32
    %151 = vector.broadcast %cst_47 : f32 to vector<16x1xf32>
    %152 = arith.divf %151, %150 : vector<16x1xf32>
    %153 = vector.broadcast %152 : vector<16x1xf32> to vector<16x16xf32>
    %154 = arith.mulf %148, %153 : vector<16x16xf32>
    %cst_48 = arith.constant dense<0.000000e+00> : vector<16x16xf32>
    %155 = tpu.matmul %125, %154, %cst_48 {dimension_numbers = #tpu.dot_dimension_numbers<[1], [1], [0], [0], [0, 0, 1, 0], [], []>} : vector<16x16xf32>, vector<16x16xf32>, vector<16x16xf32> -> vector<16x16xf32>
    %156 = vector.broadcast %2 : f32 to vector<16x16xf32>
    %157 = arith.mulf %156, %155 : vector<16x16xf32>
    %158 = arith.addf %157, %125 : vector<16x16xf32>
    %159 = arith.index_cast %c3_i32 : i32 to index
    %c0_49 = arith.constant 0 : index
    %c0_50 = arith.constant 0 : index
    %160 = vector.load %arg3[%159, %c0_49, %c0_50] : memref<4x16x16xf32, #tpu.memory_space<vmem>>, vector<1x16x16xf32>
    %161 = vector.shape_cast %160 : vector<1x16x16xf32> to vector<16x16xf32>
    %162 = vector.shape_cast %158 : vector<16x16xf32> to vector<1x16x16xf32>
    tpu.vector_store %arg3[%159, %c0_49, %c0_50], %162 {strides = array<i32>} : memref<4x16x16xf32, #tpu.memory_space<vmem>>, vector<1x16x16xf32>,
    %c4_i32 = arith.constant 4 : i32
    return
  }
  func.func @transform_0(%arg0: i32) -> i32 {
    %c0_i32 = arith.constant 0 : i32
    %c0_i32_0 = arith.constant 0 : i32
    return %c0_i32 : i32
  }
  func.func @transform_1(%arg0: i32) -> (i32, i32, i32) {
    %c0_i32 = arith.constant 0 : i32
    %c0_i32_0 = arith.constant 0 : i32
    %c0_i32_1 = arith.constant 0 : i32
    return %arg0, %c0_i32, %c0_i32_0 : i32, i32, i32
  }
  func.func @transform_2(%arg0: i32) -> (i32, i32, i32) {
    %c0_i32 = arith.constant 0 : i32
    %c0_i32_0 = arith.constant 0 : i32
    %c0_i32_1 = arith.constant 0 : i32
    return %arg0, %c0_i32, %c0_i32_0 : i32, i32, i32
  }
}

</mosaic_0001>

<bundles_post_ra>
// kernel: tpu_custom_call.1
= control target key start
LH: loop header
LB: loop body
LE: loop exit
PB: predicated region body
PF: predicated region fallthrough
CT: control target
= control target key end

     0   :  { %7 = vsyncpa [#allocation5], 0  ;;  %s2148_s0 = inlined_call_operand.hbm [shape: f32[3], index: 0, kind: input, shape index: {}]   ;;  %s2149_s1 = inlined_call_operand.hbm [shape: f32[8,16,16], index: 1, kind: input, shape index: {}]   ;;  %s2150_s2 = inlined_call_operand.hbm [shape: f32[8,16,16], index: 2, kind: output, shape index: {}]  }
   0x1   :  { %8 = vsyncpa [#allocation3], 0 }
   0x2   :  { %10 = vsyncpa [#allocation3 + $0x1], 0 }
   0x3   :  { %11 = vsyncpa [#allocation4], 0 }
   0x4   :  { %13 = vsyncpa [#allocation4 + $0x1], 0  ;;  %s1773_s9 = smov 0   ;;  %s1775_s10 = smov 0  }
   0x5   :  { %s1777_s11 = smov 0   ;;  %s1779_s12 = smov 0  }
   0x6 LB: > { %s1794_s13 = sadd.s32 4294967295, %s1749_s12   ;;  %s1338_s14 = sadd.s32 4294967294, %s1749_s12   ;;  %s1749_s12 = sphi %s1779_s12, %s2172_s12   ;;  %s1745_s11 = sphi %s1777_s11, %s2171_s11   ;;  %s1741_s10 = sphi %s1775_s10, %s2170_s10   ;;  %s1737_s9 = sphi %s1773_s9, %s2169_s9  }
   0x7   : > { %s1798_s15 = sadd.s32 1, %s1749_s12   ;;  %s47_s16 = sadd.s32 1, %s1745_s11 }
   0x8   : > { %s44_s17 = ssub.s32 %s1749_s12, %s1798_s15  ;;  %p54_p0 = scmp.ne.s32.totalorder %s1745_s11, %s1741_s10 }
   0x9   : > { %p45_p1 = scmp.eq.s32.totalorder %s44_s17, 0  ;;  %p55_p2 = scmp.eq.s32.totalorder %s1749_s12, 0 }
   0xa   : > { %p60_p3 = scmp.ne.s32.totalorder %s1741_s10, %s1737_s9  ;;  %p2151_p4 = scmp.eq.s32.totalorder %s1794_s13, 0 }
   0xb   : > { %s1810_s18 = scalar_select %p45_p1, %s1745_s11, %s47_s16  }
   0xc   : > { %p1812_p5 = por %p55_p2, %p54_p0  ;;  %p1818_p6 = por %p2151_p4, %p60_p3 }
   0xd   : > { %p84_p7 = scmp.eq.s32.totalorder %s1794_s13, 1  ;;  %p90_p8 = scmp.eq.s32.totalorder %s1338_s14, 1 }
   0xe   : > { %s2155_s20 = scalar_select %p1818_p6, 1, 0 }
   0xf   : > { %p1339_p9 = scmp.ge.s32.totalorder %s1749_s12, 1  ;;  %p97_p10 = scmp.lt.s32.totalorder %s1749_s12, 3 }
  0x10   : > { %p1825_p11 = por %p84_p7, %p54_p0  ;;  %p1829_p12 = por %p90_p8, %p60_p3 }
  0x11   : > { %p1833_p13 = pnand %p1339_p9, %p97_p10  ;;  %p1547_p4 = scmp.lt.s32.totalorder %s1749_s12, 2 }
  0x12   : > { %s2156_s21 = scalar_select %p1825_p11, 1, 0 }
  0x13   : > { %s2157_s22 = scalar_select %p1829_p12, 1, 0 }
  0x14   : > { %p1534_p2 = pneg %p1833_p13  ;;  %s119_s24 = sand.u32 1, %s1745_s11  }
  0x15   : > { %s1395_s25 = sshll.u32 %s1749_s12, 10  ;;  %p2159_p6 = scmp.eq.s32.totalorder %s1794_s13, 0 }
  0x16   : > { %p1847_p7 = pnand %p1547_p4, %p1812_p5  ;;  %s1342_s27 = sshll.u32 %s119_s24, 6 }
  0x17   : > { %p1535_p0 = pnand %p1534_p2, %p2159_p6  ;;  %s1636_s30 = scalar_lea.hbm %s2148_s0, 16 }
  0x18   : > { %p1637_p3 = scmp.ne.s32.totalorder %s2148_s0, %s1636_s30  ;;  %p1643_p6 = scmp.lt.u32.totalorder %s1636_s30, %s2148_s0 }
  0x19   : > { %p1638_p8 = pneg %p1535_p0 }
  0x1b   : > { %p1639_p9 = pnand %p1638_p8, %p1637_p3 }
  0x1d   : > { %p1640_p10 = pneg %p1639_p9 }
  0x1f   : > { %p1645_p4 = pnand %p1643_p6, %p1640_p10 }
  0x21   : > { %1648 = shalt.err (!%p1645_p4)
}
  0x22   : > { %s1751_s7 = smov [#allocation2]   ;;  %s1866_s19 = scalar_lea.hbm %s2149_s1, %s1395_s25 }
  0x23   : > { %1537 = dma.hbm_to_smem (!%p1535_p0), %s2148_s0, 16, %s1751_s7, [#allocation5]  }
  0x24   : > { %s123_s28 = scalar_lea.vmem [#allocation6], %s1342_s27  ;;  %s1870_s30 = scalar_lea.sflag [#allocation3], %s119_s24 }
  0x25   : > { %s131_s29 = sshll.u32 %s123_s28, 4  ;;  %s1649_s3 = scalar_lea.hbm %s1866_s19, 1024  ;;  %s1868_s29 = int_to_ptr.vmem [resolvable:$true] %s131_s29 }
  0x26   : > { %p1650_p5 = scmp.ne.s32.totalorder %s1866_s19, %s1649_s3  ;;  %p1651_p2 = pneg %p1847_p7 }
  0x27   : > { %s1654_s5 = scalar_lea.hbm %s2149_s1, 2048  ;;  %p1655_p8 = scmp.lt.u32.totalorder %s1866_s19, %s2149_s1 }
  0x28   : > { %p1652_p0 = pnand %p1651_p2, %p1650_p5  ;;  %p1656_p9 = scmp.lt.u32.totalorder %s1654_s5, %s1649_s3 }
  0x29   : > { %p1658_p6 = scmp.lt.u32.totalorder %s1649_s3, %s1866_s19 }
  0x2a   : > { %p1653_p3 = pneg %p1652_p0  ;;  %p1657_p10 = por %p1656_p9, %p1655_p8 }
  0x2c   : > { %p1659_p4 = por %p1658_p6, %p1657_p10 }
  0x2e   : > { %p1660_p1 = pnand %p1659_p4, %p1653_p3 }
  0x30   : > { %1663 = shalt.err (!%p1660_p1)
}
  0x31   : > { %s1664_s24 = scalar_lea.vmem %s1868_s29, 1024  ;;  %s1752_s27 = smov [#allocation6]  }
  0x32   : > { %p1665_p5 = scmp.ne.s32.totalorder %s1868_s29, %s1664_s24  ;;  %s1669_s8 = sshll.u32 %s1752_s27, 4  ;;  %s1670_s8 = int_to_ptr.vmem [resolvable:$false] %s1669_s8 }
  0x33   : > { %s1671_s14 = scalar_lea.vmem %s1670_s8, 2048  ;;  %p1672_p11 = scmp.lt.s32.totalorder %s1868_s29, %s1670_s8 }
  0x34   : > { %p1667_p0 = pnand %p1665_p5, %p1651_p2  ;;  %p1673_p8 = scmp.lt.s32.totalorder %s1671_s14, %s1664_s24 }
  0x36   : > { %p1668_p12 = pneg %p1667_p0  ;;  %p1674_p9 = por %p1673_p8, %p1672_p11 }
  0x38   : > { %p1675_p10 = pnand %p1674_p9, %p1668_p12 }
  0x3a   : > { %1678 = shalt.err (!%p1675_p10)
}
  0x3b   : > { %s1753_s16 = smov 128   ;;  %s1754_s17 = smov 8  }
  0x3c   : > { %1541 = dma.hbm_to_vmem [thread:$0]  (!%p1847_p7), %s1866_s19, 1024, %s1868_s29, %s1870_s30, %s1753_s16, %s1753_s16, %s1754_s17  }
  0x3d   : > { %143 = sbr.rel (%p1833_p13) target bundleno = 1593 (0x639), region = 28  ;;  %p2161_p1 = scmp.eq.s32.totalorder (!%p1833_p13), %s1794_s13, 0 }
  0x44   : > { %1724 = dma.done.wait (%p2161_p1), [#allocation5], 16   ;;  %p2162_p2 = pmov %p2161_p1 }
  0x45   : > { %s1905_s28 = sand.u32 1, %s1741_s10   ;;  %p2163_p11 = scmp.ne.s32.totalorder %s2155_s20, 0 }
  0x46   : > { %1726 = vsyncadd (%p2162_p2), [#allocation5], 4294967280  ;;  %s1348_s3 = sshll.u32 %s1905_s28, 6  ;;  %s150_s25 = scalar_lea.sflag [#allocation3], %s1905_s28 }
  0x47   : > { %s1911_s26 = scalar_lea.vmem [#allocation6], %s1348_s3 }
  0x48   : > { %1728 = dma.done.wait (%p2163_p11), %s150_s25, 1024  }
  0x49   : > { %1730 = vsyncadd (%p2163_p11), %s150_s25, 4294966272 }
  0x4a   : > { %158 = sfence }
  0x4b   : > { %v1918_v0 = vld [vmem:[%s1911_s26] sm:$0xff]  ;;  %v1921_v1 = vld [vmem:[%s1911_s26 + $0x10] sm:$0xff]  ;;  %v1924_v2 = vld [vmem:[%s1911_s26 + $0x8] sm:$0xff]  ;;  %vm214_vm0 = vcmask 130048   ;;  %s1350_s20 = sld [smem:[#allocation2 + $0x1]]  ;;  %s177_s23 = sld [smem:[#allocation2]] }
  0x4c   : > { %182 = vxpose.xlu0.b32.start [1/2] (short) (narrow) %v1918_v0, 16  ;;  %449 = vxpose.xlu1.b32.start [1/2] (short) (narrow) %v1921_v1, 16  ;;  %v1486_v3 = vpack.c.bf16 %v1924_v2, %v1918_v0  ;;  %v1931_v4 = vld [vmem:[%s1911_s26 + $0x18] sm:$0xff]  ;;  %v296_v10 = vsel %vm214_vm0, %v1918_v0, 0.0  ;;  %v297_v11 = vsel %vm214_vm0, %v1924_v2, 0.0  ;;  %v562_v12 = vsel %vm214_vm0, %v1921_v1, 0.0  ;;  %vm1993_vm1 = vmpackc.low %vm214_vm0, %vm214_vm0 }
  0x4d   : > { %v1496_v5 = vpack.c.bf16 %v1931_v4, %v1921_v1  ;;  %v563_v13 = vsel %vm214_vm0, %v1931_v4, 0.0  ;;  %v298_v14 = vadd.f32 %v297_v11, %v296_v10  ;;  %s1351_s19 = sld [smem:[#allocation2 + $0x2]]  ;;  %s2037_s29 = scalar_lea.vmem [#allocation7], %s1348_s3 }
  0x4e   : > { %1487 = vmatprep.subr.bf16.mxu1 %v1486_v3  ;;  %v564_v15 = vadd.f32 %v563_v13, %v562_v12  ;;  %s1397_s30 = sshll.u32 %s1794_s13, 10  ;;  %s1253_s4 = sshll.u32 %s2037_s29, 4  ;;  %s2099_s4 = int_to_ptr.vmem [resolvable:$true] %s1253_s4 }
  0x4f   : > { %1489 = vmatpush3.bf16.msra.mxu1 %v1486_v3  ;;  %1497 = vmatprep.subr.bf16.mxu0 %v1496_v5  ;;  %v299_v16 = vrot.slane %v298_v14, 4  ;;  %s2097_s7 = scalar_lea.hbm %s2150_s2, %s1397_s30  ;;  %s1239_s13 = scalar_lea.sflag [#allocation4], %s1905_s28 }
  0x50   : > { %183 = vxpose.xlu0.b32.end [2/2] (short) (narrow) %v1924_v2, 16  ;;  %450 = vxpose.xlu1.b32.end [2/2] (short) (narrow) %v1931_v4, 16  ;;  %v565_v17 = vrot.slane %v564_v15, 4  ;;  %s1679_s24 = scalar_lea.vmem %s2099_s4, 1024  ;;  %p2166_p13 = scmp.ne.s32.totalorder %s2156_s21, 0 }
  0x51   : > { %1499 = vmatpush3.bf16.msra.mxu0 %v1496_v5  ;;  %v300_v18 = vadd.f32 %v299_v16, %v298_v14  ;;  %v1953_v27 = vstv %s1350_s20  ;;  %v1955_v29 = vstv %s177_s23  ;;  %p1680_p12 = scmp.ne.s32.totalorder %s2099_s4, %s1679_s24  ;;  %s1755_s27 = smov [#allocation7]  }
  0x52   : > { %v566_v19 = vadd.f32 %v565_v17, %v564_v15  ;;  %s1683_s8 = sshll.u32 %s1755_s27, 4  ;;  %s1684_s8 = int_to_ptr.vmem [resolvable:$false] %s1683_s8 }
  0x53   : > { %v301_v20 = vrot.slane %v300_v18, 2  ;;  %p1681_p7 = pnand %p1680_p12, %p2166_p13  ;;  %s1685_s14 = scalar_lea.vmem %s1684_s8, 2048 }
  0x54   : > { %v567_v21 = vrot.slane %v566_v19, 2  ;;  %p1686_p6 = scmp.lt.s32.totalorder %s2099_s4, %s1684_s8  ;;  %p1687_p4 = scmp.lt.s32.totalorder %s1685_s14, %s1679_s24 }
  0x55   : > { %v302_v22 = vadd.f32 %v301_v20, %v300_v18  ;;  %p1682_p3 = pneg %p1681_p7 }
  0x56   : > { %v568_v23 = vadd.f32 %v567_v21, %v566_v19  ;;  %p1688_p5 = por %p1687_p4, %p1686_p6 }
  0x57   : > { %v303_v24 = vrot.slane %v302_v22, 1 }
  0x58   : > { %v569_v25 = vrot.slane %v568_v23, 1  ;;  %p1689_p0 = pnand %p1688_p5, %p1682_p3 }
  0x59   : > { %v304_v26 = vadd.f32 %v303_v24, %v302_v22 }
  0x5a   : > { %v570_v28 = vadd.f32 %v569_v25, %v568_v23 }
  0x5b   : > { %v309_v30 = vmul.f32 %v1953_v27, %v304_v26 }
  0x5c   : > { %v573_v33 = vmul.f32 %v570_v28, %v1953_v27 }
  0xcc   : > { %v198_v6 = vpop.trf.xlu0  ;;  %v465_v7 = vpop.trf.xlu1 }
  0xcd   : > { %1434 = vmatprep.mubr.msk.f32.mxu1 %vm214_vm0, %v198_v6  ;;  %1448 = vmatprep.mubr.msk.f32.mxu0 %vm214_vm0, %v465_v7 }
  0xd0   : > { %v199_v8 = vpop.trf.xlu0  ;;  %v466_v9 = vpop.trf.xlu1 }
  0xd1   : > { %1435 = vmatmul.mubr.msk.f32.vlgmr.msra.gmra.mrb[0].mxu1 %vm214_vm0, %v199_v8  ;;  %1449 = vmatmul.mubr.msk.f32.vlgmr.msra.gmra.mrb[0].mxu0 %vm214_vm0, %v466_v9 }
  0xd2   : > { %1441 = vmatprep.mubr.msk.f32.mxu1 %vm214_vm0, %v1918_v0  ;;  %1455 = vmatprep.mubr.msk.f32.mxu0 %vm214_vm0, %v1921_v1 }
 0x1a4   : > { %v1436_v31 = vpop.f32.mrb[0].mxu1  ;;  %v1450_v32 = vpop.f32.mrb[0].mxu0 }
 0x1a5   : > { %v307_v34 = vmul.f32 %v1436_v31, %v1955_v29  ;;  %v287_v35 = vpop.f32.mrb[1].mxu1  ;;  %v553_v36 = vpop.f32.mrb[1].mxu0  ;;  %v572_v40 = vmul.f32 %v1450_v32, %v1955_v29 }
 0x1a6   : > { %v306_v37 = vmul.f32 %v1955_v29, %v287_v35  ;;  %v571_v38 = vmul.f32 %v553_v36, %v1955_v29  ;;  %v1980_v35 = vld [vmem:[%s1911_s26 + $0x28] sm:$0xff]  ;;  %v1983_v36 = vld [vmem:[%s1911_s26 + $0x30] sm:$0xff] }
 0x1a7   : > { %v311_v39 = vadd.f32 %v309_v30, %v307_v34  ;;  %v575_v45 = vadd.f32 %v573_v33, %v572_v40  ;;  %v1976_v34 = vld [vmem:[%s1911_s26 + $0x20] sm:$0xff] }
 0x1a8   : > { %v310_v41 = vadd.f32 %v309_v30, %v306_v37  ;;  %v574_v42 = vadd.f32 %v573_v33, %v571_v38  ;;  %v1988_v37 = vld [vmem:[%s1911_s26 + $0x38] sm:$0xff] }
 0x1a9   : > { %v315_v43 = vsel %vm214_vm0, %v311_v39, -inf  ;;  %v321_v47 = vsel %vm214_vm0, %v311_v39, inf  ;;  %v579_v48 = vsel %vm214_vm0, %v575_v45, -inf  ;;  %v585_v51 = vsel %vm214_vm0, %v575_v45, inf }
 0x1aa   : > { %316 = vmax.xlane.f32.xlu1 %v315_v43  ;;  %v312_v44 = vsel %vm214_vm0, %v310_v41, -inf  ;;  %v576_v46 = vsel %vm214_vm0, %v574_v42, -inf  ;;  %v582_v49 = vsel %vm214_vm0, %v574_v42, inf  ;;  %v318_v50 = vsel %vm214_vm0, %v310_v41, inf }
 0x1ab   : > { %313 = vmax.xlane.f32.xlu0 %v312_v44 }
 0x1ae   : > { %322 = vmin.xlane.f32.xlu1 %v321_v47 }
 0x1af   : > { %577 = vmax.xlane.f32.xlu0 %v576_v46 }
 0x1b2   : > { %580 = vmax.xlane.f32.xlu1 %v579_v48  ;;  %v1506_v48 = vpack.c.bf16 %v1980_v35, %v1976_v34 }
 0x1b3   : > { %583 = vmin.xlane.f32.xlu0 %v582_v49 }
 0x1b6   : > { %319 = vmin.xlane.f32.xlu1 %v318_v50 }
 0x1ba   : > { %586 = vmin.xlane.f32.xlu1 %v585_v51 }
 0x237   : > { %v317_v52 = vpop.xlane.xlu1 %316 }
 0x238   : > { %v314_v53 = vpop.xlane.xlu0 %313  ;;  %v333_v7 = vsub.f32 %v311_v39, %v317_v52 }
 0x239   : > { %v332_v14 = vsub.f32 %v310_v41, %v314_v53 }
 0x23b   : > { %v323_v54 = vpop.xlane.xlu1 %322 }
 0x23c   : > { %v325_v55 = vsub.f32 %v317_v52, %v323_v54  ;;  %v578_v56 = vpop.xlane.xlu0 %577  ;;  %v1516_v54 = vpack.c.bf16 %v1988_v37, %v1983_v36 }
 0x23d   : > { %v596_v13 = vsub.f32 %v574_v42, %v578_v56 }
 0x23e   : > { %v327_v57 = vadd.f32 1e-08, %v325_v55 }
 0x23f   : > { %v581_v58 = vpop.xlane.xlu1 %580 }
 0x240   : > { %1588 = vrcp.f32 %v327_v57  ;;  %v584_v59 = vpop.xlane.xlu0 %583  ;;  %v597_v18 = vsub.f32 %v575_v45, %v581_v58 }
 0x241   : > { %v588_v60 = vsub.f32 %v578_v56, %v584_v59  ;;  %v826_v59 = vsel %vm214_vm0, %v1976_v34, 0.0 }
 0x243   : > { %v590_v61 = vadd.f32 1e-08, %v588_v60  ;;  %v320_v62 = vpop.xlane.xlu1 %319  ;;  %v827_v60 = vsel %vm214_vm0, %v1980_v35, 0.0 }
 0x244   : > { %v324_v63 = vsub.f32 %v314_v53, %v320_v62  ;;  %v1090_v62 = vsel %vm214_vm0, %v1983_v36, 0.0 }
 0x245   : > { %1590 = vrcp.f32 %v590_v61  ;;  %v828_v61 = vadd.f32 %v827_v60, %v826_v59 }
 0x246   : > { %v326_v3 = vadd.f32 1e-08, %v324_v63  ;;  %v1091_v63 = vsel %vm214_vm0, %v1988_v37, 0.0 }
 0x247   : > { %v587_v5 = vpop.xlane.xlu1 %586 }
 0x248   : > { %1592 = vrcp.f32 %v326_v3  ;;  %v589_v6 = vsub.f32 %v581_v58, %v587_v5  ;;  %v829_v3 = vrot.slane %v828_v61, 4  ;;  %v1092_v5 = vadd.f32 %v1091_v63, %v1090_v62 }
 0x24a   : > { %v1589_v8 = vpop.eup %1588  ;;  %v591_v9 = vadd.f32 1e-08, %v589_v6  ;;  %v830_v6 = vadd.f32 %v829_v3, %v828_v61 }
 0x24b   : > { %v335_v10 = vmul.f32 %v1589_v8, %v333_v7  ;;  %v2029_v7 = vstv %s1351_s19  ;;  %v1093_v8 = vrot.slane %v1092_v5, 4 }
 0x24c   : > { %1594 = vrcp.f32 %v591_v9 }
 0x24d   : > { %v338_v11 = vmul.f32 1.442695, %v335_v10  ;;  %v831_v10 = vrot.slane %v830_v6, 2 }
 0x24f   : > { %v1591_v12 = vpop.eup %1590  ;;  %1596 = vpow2.f32 %v338_v11 }
 0x250   : > { %v598_v15 = vmul.f32 %v1591_v12, %v596_v13 }
 0x252   : > { %v1593_v16 = vpop.eup %1592  ;;  %v600_v20 = vmul.f32 1.442695, %v598_v15 }
 0x253   : > { %v334_v17 = vmul.f32 %v1593_v16, %v332_v14  ;;  %v1094_v14 = vadd.f32 %v1093_v8, %v1092_v5 }
 0x255   : > { %v336_v19 = vmul.f32 1.442695, %v334_v17  ;;  %v832_v17 = vadd.f32 %v831_v10, %v830_v6 }
 0x256   : > { %v1595_v21 = vpop.eup %1594 }
 0x257   : > { %1598 = vpow2.f32 %v336_v19  ;;  %v599_v22 = vmul.f32 %v1595_v21, %v597_v18  ;;  %v1095_v21 = vrot.slane %v1094_v14, 2 }
 0x258   : > { %1600 = vpow2.f32 %v600_v20 }
 0x259   : > { %v1597_v23 = vpop.eup %1596  ;;  %v602_v24 = vmul.f32 1.442695, %v599_v22 }
 0x25a   : > { %v343_v25 = vsel %vm214_vm0, %v1597_v23, 0.0 }
 0x25b   : > { %344 = vadd.xlane.f32.xlu1 %v343_v25  ;;  %1602 = vpow2.f32 %v602_v24  ;;  %v1096_v24 = vadd.f32 %v1095_v21, %v1094_v14 }
 0x261   : > { %v1599_v26 = vpop.eup %1598 }
 0x262   : > { %v340_v28 = vsel %vm214_vm0, %v1599_v26, 0.0  ;;  %v1601_v30 = vpop.eup %1600 }
 0x263   : > { %341 = vadd.xlane.f32.xlu0 %v340_v28  ;;  %v604_v33 = vsel %vm214_vm0, %v1601_v30, 0.0 }
 0x265   : > { %v1603_v31 = vpop.eup %1602 }
 0x266   : > { %v607_v32 = vsel %vm214_vm0, %v1603_v31, 0.0 }
 0x267   : > { %608 = vadd.xlane.f32.xlu1 %v607_v32  ;;  %605 = vadd.xlane.f32.xlu0 %v604_v33 }
 0x294   : > { %713 = vxpose.xlu0.b32.start [1/2] (short) (narrow) %v1976_v34, 16 }
 0x298   : > { %714 = vxpose.xlu0.b32.end [2/2] (short) (narrow) %v1980_v35, 16 }
 0x29a   : > { %977 = vxpose.xlu1.b32.start [1/2] (short) (narrow) %v1983_v36, 16 }
 0x29e   : > { %978 = vxpose.xlu1.b32.end [2/2] (short) (narrow) %v1988_v37, 16 }
 0x2e8   : > { %v345_v38 = vpop.xlane.xlu1 %344 }
 0x2e9   : > { %1604 = vrcp.f32 %v345_v38 }
 0x2f0   : > { %v342_v39 = vpop.xlane.xlu0 %341 }
 0x2f1   : > { %1606 = vrcp.f32 %v342_v39 }
 0x2f3   : > { %v1605_v42 = vpop.eup %1604 }
 0x2f4   : > { %v609_v40 = vpop.xlane.xlu1 %608  ;;  %v606_v41 = vpop.xlane.xlu0 %605  ;;  %v351_v45 = vmul.f32 %v1605_v42, %v1597_v23 }
 0x2f5   : > { %1608 = vrcp.f32 %v609_v40 }
 0x2f6   : > { %1610 = vrcp.f32 %v606_v41 }
 0x2fb   : > { %v1607_v43 = vpop.eup %1606 }
 0x2fc   : > { %v350_v44 = vmul.f32 %v1607_v43, %v1599_v26  ;;  %v1097_v26 = vrot.slane %v1096_v24, 1 }
 0x2fe   : > { %v1490_v47 = vpack.c.bf16 %v351_v45, %v350_v44  ;;  %v1098_v33 = vadd.f32 %v1097_v26, %v1096_v24 }
 0x2ff   : > { %v1609_v49 = vpop.eup %1608 }
 0x300   : > { %v1611_v50 = vpop.eup %1610  ;;  %1492 = vmatprep.subr.msk.bf16.mxu1 %vm1993_vm1, %v1490_v47  ;;  %v615_v51 = vmul.f32 %v1609_v49, %v1603_v31  ;;  %v1101_v40 = vmul.f32 %v1098_v33, %v1953_v27 }
 0x301   : > { %1495 = vmatpush3.bf16.xpose.msk.msra.mxu1 %vm1993_vm1, %v1490_v47  ;;  %v614_v52 = vmul.f32 %v1611_v50, %v1601_v30 }
 0x302   : > { %1507 = vmatprep.subr.bf16.mxu1 %v1506_v48 }
 0x303   : > { %v1500_v53 = vpack.c.bf16 %v615_v51, %v614_v52 }
 0x305   : > { %1502 = vmatprep.subr.msk.bf16.mxu0 %vm1993_vm1, %v1500_v53 }
 0x306   : > { %1505 = vmatpush3.bf16.xpose.msk.msra.mxu0 %vm1993_vm1, %v1500_v53 }
 0x307   : > { %1517 = vmatprep.subr.bf16.mxu0 %v1516_v54 }
 0x308   : > { %1442 = vmatmul.mubr.msk.f32.vlgmr.msra.gmra.mrb[2].mxu1 %vm214_vm0, %v1924_v2 }
 0x309   : > { %1509 = vmatpush3.bf16.msra.mxu1 %v1506_v48 }
 0x30d   : > { %1456 = vmatmul.mubr.msk.f32.vlgmr.msra.gmra.mrb[2].mxu0 %vm214_vm0, %v1931_v4 }
 0x30e   : > { %1519 = vmatpush3.bf16.msra.mxu0 %v1516_v54 }
 0x314   : > { %v729_v55 = vpop.trf.xlu0 }
 0x315   : > { %1462 = vmatprep.mubr.msk.f32.mxu1 %vm214_vm0, %v729_v55 }
 0x318   : > { %v730_v56 = vpop.trf.xlu0 }
 0x319   : > { %1463 = vmatmul.mubr.msk.f32.vlgmr.msra.gmra.mrb[4].mxu1 %vm214_vm0, %v730_v56 }
 0x31a   : > { %v993_v57 = vpop.trf.xlu1  ;;  %1469 = vmatprep.mubr.msk.f32.mxu1 %vm214_vm0, %v1976_v34 }
 0x31b   : > { %1476 = vmatprep.mubr.msk.f32.mxu0 %vm214_vm0, %v993_v57 }
 0x31e   : > { %v994_v58 = vpop.trf.xlu1 }
 0x31f   : > { %1477 = vmatmul.mubr.msk.f32.vlgmr.msra.gmra.mrb[4].mxu0 %vm214_vm0, %v994_v58 }
 0x320   : > { %1483 = vmatprep.mubr.msk.f32.mxu0 %vm214_vm0, %v1983_v36 }
 0x3db   : > { %v1443_v9 = vpop.f32.mrb[2].mxu1 }
 0x3dc   : > { %v441_v11 = vmul.f32 %v1443_v9, %v2029_v7  ;;  %v430_v12 = vpop.f32.mrb[3].mxu1 }
 0x3dd   : > { %v440_v13 = vmul.f32 %v2029_v7, %v430_v12 }
 0x3de   : > { %v443_v15 = vadd.f32 %v441_v11, %v1924_v2 }
 0x3df   : > { %v442_v16 = vadd.f32 %v440_v13, %v1918_v0  ;;  %v833_v0 = vrot.slane %v832_v17, 1 }
 0x3e0   : > { %445 = vst.msk [vmem:[%s2037_s29 + $0x8] sm:$0xff] %vm214_vm0, %v443_v15  ;;  %v1457_v18 = vpop.f32.mrb[2].mxu0 }
 0x3e1   : > { %444 = vst.msk [vmem:[%s2037_s29] sm:$0xff] %vm214_vm0, %v442_v16  ;;  %v704_v19 = vmul.f32 %v1457_v18, %v2029_v7  ;;  %v694_v20 = vpop.f32.mrb[3].mxu0  ;;  %v834_v25 = vadd.f32 %v833_v0, %v832_v17 }
 0x3e2   : > { %v703_v2 = vmul.f32 %v694_v20, %v2029_v7 }
 0x3e3   : > { %v706_v22 = vadd.f32 %v1931_v4, %v704_v19  ;;  %v837_v28 = vmul.f32 %v834_v25, %v1953_v27 }
 0x3e4   : > { %v705_v23 = vadd.f32 %v1921_v1, %v703_v2 }
 0x3e5   : > { %1367 = vst.msk [vmem:[%s2037_s29 + $0x18] sm:$0xff] %vm214_vm0, %v706_v22 }
 0x3e6   : > { %1366 = vst.msk [vmem:[%s2037_s29 + $0x10] sm:$0xff] %vm214_vm0, %v705_v23 }
 0x3ec   : > { %v1464_v30 = vpop.f32.mrb[4].mxu1 }
 0x3ed   : > { %v836_v31 = vmul.f32 %v1464_v30, %v1955_v29  ;;  %v817_v32 = vpop.f32.mrb[5].mxu1 }
 0x3ee   : > { %v835_v38 = vmul.f32 %v817_v32, %v1955_v29 }
 0x3ef   : > { %v839_v39 = vadd.f32 %v837_v28, %v836_v31 }
 0x3f0   : > { %v838_v4 = vadd.f32 %v837_v28, %v835_v38 }
 0x3f1   : > { %v843_v1 = vsel %vm214_vm0, %v839_v39, -inf  ;;  %v849_v48 = vsel %vm214_vm0, %v839_v39, inf }
 0x3f2   : > { %844 = vmax.xlane.f32.xlu1 %v843_v1  ;;  %v1478_v41 = vpop.f32.mrb[4].mxu0  ;;  %v840_v42 = vsel %vm214_vm0, %v838_v4, -inf  ;;  %v846_v50 = vsel %vm214_vm0, %v838_v4, inf }
 0x3f3   : > { %v1100_v43 = vmul.f32 %v1478_v41, %v1955_v29  ;;  %841 = vmax.xlane.f32.xlu0 %v840_v42  ;;  %v1081_v44 = vpop.f32.mrb[5].mxu0 }
 0x3f4   : > { %v1099_v45 = vmul.f32 %v1081_v44, %v1955_v29 }
 0x3f5   : > { %v1103_v47 = vadd.f32 %v1101_v40, %v1100_v43 }
 0x3f6   : > { %v1102_v49 = vadd.f32 %v1101_v40, %v1099_v45  ;;  %850 = vmin.xlane.f32.xlu1 %v849_v48 }
 0x3f7   : > { %847 = vmin.xlane.f32.xlu0 %v846_v50  ;;  %v1107_v27 = vsel %vm214_vm0, %v1103_v47, -inf  ;;  %v1113_v52 = vsel %vm214_vm0, %v1103_v47, inf }
 0x3f8   : > { %v1104_v51 = vsel %vm214_vm0, %v1102_v49, -inf  ;;  %v1110_v53 = vsel %vm214_vm0, %v1102_v49, inf }
 0x3fa   : > { %1108 = vmax.xlane.f32.xlu1 %v1107_v27 }
 0x3fb   : > { %1105 = vmax.xlane.f32.xlu0 %v1104_v51 }
 0x3fe   : > { %1114 = vmin.xlane.f32.xlu1 %v1113_v52 }
 0x3ff   : > { %1111 = vmin.xlane.f32.xlu0 %v1110_v53 }
 0x47f   : > { %v845_v29 = vpop.xlane.xlu1 %844 }
 0x480   : > { %v842_v54 = vpop.xlane.xlu0 %841  ;;  %v861_v10 = vsub.f32 %v839_v39, %v845_v29 }
 0x481   : > { %v860_v12 = vsub.f32 %v838_v4, %v842_v54 }
 0x483   : > { %v851_v55 = vpop.xlane.xlu1 %850 }
 0x484   : > { %v853_v56 = vsub.f32 %v845_v29, %v851_v55  ;;  %v848_v57 = vpop.xlane.xlu0 %847 }
 0x485   : > { %v852_v58 = vsub.f32 %v842_v54, %v848_v57 }
 0x486   : > { %v855_v59 = vadd.f32 1e-08, %v853_v56 }
 0x487   : > { %v854_v60 = vadd.f32 1e-08, %v852_v58  ;;  %v1109_v61 = vpop.xlane.xlu1 %1108 }
 0x488   : > { %1612 = vrcp.f32 %v855_v59  ;;  %v1106_v62 = vpop.xlane.xlu0 %1105  ;;  %v1125_v18 = vsub.f32 %v1103_v47, %v1109_v61 }
 0x489   : > { %1614 = vrcp.f32 %v854_v60  ;;  %v1124_v20 = vsub.f32 %v1102_v49, %v1106_v62 }
 0x48b   : > { %v1115_v63 = vpop.xlane.xlu1 %1114 }
 0x48c   : > { %v1117_v3 = vsub.f32 %v1109_v61, %v1115_v63  ;;  %v1112_v5 = vpop.xlane.xlu0 %1111 }
 0x48d   : > { %v1116_v6 = vsub.f32 %v1106_v62, %v1112_v5 }
 0x48e   : > { %v1119_v8 = vadd.f32 1e-08, %v1117_v3 }
 0x48f   : > { %v1118_v9 = vadd.f32 1e-08, %v1116_v6 }
 0x490   : > { %1616 = vrcp.f32 %v1119_v8 }
 0x491   : > { %1618 = vrcp.f32 %v1118_v9 }
 0x492   : > { %v1613_v11 = vpop.eup %1612 }
 0x493   : > { %v1615_v13 = vpop.eup %1614  ;;  %v863_v14 = vmul.f32 %v1613_v11, %v861_v10 }
 0x494   : > { %v862_v15 = vmul.f32 %v1615_v13, %v860_v12 }
 0x495   : > { %v866_v16 = vmul.f32 1.442695, %v863_v14 }
 0x496   : > { %v864_v17 = vmul.f32 1.442695, %v862_v15 }
 0x497   : > { %1620 = vpow2.f32 %v866_v16 }
 0x498   : > { %1622 = vpow2.f32 %v864_v17 }
 0x49a   : > { %v1617_v19 = vpop.eup %1616 }
 0x49b   : > { %v1619_v21 = vpop.eup %1618  ;;  %v1127_v2 = vmul.f32 %v1617_v19, %v1125_v18 }
 0x49c   : > { %v1126_v0 = vmul.f32 %v1619_v21, %v1124_v20 }
 0x49d   : > { %v1130_v22 = vmul.f32 1.442695, %v1127_v2 }
 0x49e   : > { %v1128_v23 = vmul.f32 1.442695, %v1126_v0 }
 0x49f   : > { %1624 = vpow2.f32 %v1130_v22 }
 0x4a0   : > { %1626 = vpow2.f32 %v1128_v23 }
 0x4a1   : > { %v1621_v24 = vpop.eup %1620 }
 0x4a2   : > { %v1623_v25 = vpop.eup %1622  ;;  %v871_v26 = vsel %vm214_vm0, %v1621_v24, 0.0 }
 0x4a3   : > { %872 = vadd.xlane.f32.xlu1 %v871_v26  ;;  %v868_v28 = vsel %vm214_vm0, %v1623_v25, 0.0 }
 0x4a4   : > { %869 = vadd.xlane.f32.xlu0 %v868_v28 }
 0x4a9   : > { %v1625_v30 = vpop.eup %1624 }
 0x4aa   : > { %v1627_v31 = vpop.eup %1626  ;;  %v1135_v32 = vsel %vm214_vm0, %v1625_v30, 0.0 }
 0x4ab   : > { %1136 = vadd.xlane.f32.xlu1 %v1135_v32  ;;  %v1132_v33 = vsel %vm214_vm0, %v1627_v31, 0.0 }
 0x4ac   : > { %1133 = vadd.xlane.f32.xlu0 %v1132_v33 }
 0x530   : > { %v873_v38 = vpop.xlane.xlu1 %872 }
 0x531   : > { %1628 = vrcp.f32 %v873_v38  ;;  %v870_v39 = vpop.xlane.xlu0 %869 }
 0x532   : > { %1630 = vrcp.f32 %v870_v39 }
 0x538   : > { %v1137_v4 = vpop.xlane.xlu1 %1136 }
 0x539   : > { %1632 = vrcp.f32 %v1137_v4  ;;  %v1134_v1 = vpop.xlane.xlu0 %1133 }
 0x53a   : > { %1634 = vrcp.f32 %v1134_v1 }
 0x53b   : > { %v1629_v40 = vpop.eup %1628 }
 0x53c   : > { %v1631_v41 = vpop.eup %1630  ;;  %v879_v42 = vmul.f32 %v1629_v40, %v1621_v24 }
 0x53d   : > { %v878_v43 = vmul.f32 %v1631_v41, %v1623_v25 }
 0x53f   : > { %v1510_v44 = vpack.c.bf16 %v879_v42, %v878_v43 }
 0x541   : > { %1512 = vmatprep.subr.msk.bf16.mxu1 %vm1993_vm1, %v1510_v44 }
 0x542   : > { %1515 = vmatpush3.bf16.xpose.msk.msra.mxu1 %vm1993_vm1, %v1510_v44 }
 0x543   : > { %v1633_v45 = vpop.eup %1632 }
 0x544   : > { %v1635_v47 = vpop.eup %1634  ;;  %v1143_v48 = vmul.f32 %v1633_v45, %v1625_v30 }
 0x545   : > { %v1142_v49 = vmul.f32 %v1635_v47, %v1627_v31 }
 0x547   : > { %v1520_v50 = vpack.c.bf16 %v1143_v48, %v1142_v49 }
 0x549   : > { %1522 = vmatprep.subr.msk.bf16.mxu0 %vm1993_vm1, %v1520_v50  ;;  %1470 = vmatmul.mubr.msk.f32.vlgmr.msra.gmra.mrb[6].mxu1 %vm214_vm0, %v1980_v35 }
 0x54a   : > { %1525 = vmatpush3.bf16.xpose.msk.msra.mxu0 %vm1993_vm1, %v1520_v50 }
 0x551   : > { %1484 = vmatmul.mubr.msk.f32.vlgmr.msra.gmra.mrb[6].mxu0 %vm214_vm0, %v1988_v37 }
 0x61c   : > { %v1471_v27 = vpop.f32.mrb[6].mxu1 }
 0x61d   : > { %v968_v51 = vmul.f32 %v1471_v27, %v2029_v7  ;;  %v958_v52 = vpop.f32.mrb[7].mxu1 }
 0x61e   : > { %v967_v53 = vmul.f32 %v958_v52, %v2029_v7 }
 0x61f   : > { %v970_v29 = vadd.f32 %v1980_v35, %v968_v51 }
 0x620   : > { %v969_v54 = vadd.f32 %v1976_v34, %v967_v53 }
 0x621   : > { %1377 = vst.msk [vmem:[%s2037_s29 + $0x28] sm:$0xff] %vm214_vm0, %v970_v29 }
 0x622   : > { %1376 = vst.msk [vmem:[%s2037_s29 + $0x20] sm:$0xff] %vm214_vm0, %v969_v54 }
 0x624   : > { %v1485_v46 = vpop.f32.mrb[6].mxu0 }
 0x625   : > { %v1232_v55 = vmul.f32 %v1485_v46, %v2029_v7  ;;  %v1222_v56 = vpop.f32.mrb[7].mxu0 }
 0x626   : > { %v1231_v57 = vmul.f32 %v1222_v56, %v2029_v7 }
 0x627   : > { %v1234_v58 = vadd.f32 %v1988_v37, %v1232_v55 }
 0x628   : > { %v1233_v34 = vadd.f32 %v1983_v36, %v1231_v57 }
 0x629   : > { %1387 = vst.msk [vmem:[%s2037_s29 + $0x38] sm:$0xff] %vm214_vm0, %v1234_v58 }
 0x62a   : > { %1386 = vst.msk [vmem:[%s2037_s29 + $0x30] sm:$0xff] %vm214_vm0, %v1233_v34 }
 0x62b   : > { %1692 = shalt.err (!%p1689_p0)
}
 0x62c   : > { %s1693_s16 = scalar_lea.hbm %s2097_s7, 1024  ;;  %s1697_s25 = scalar_lea.hbm %s2150_s2, 2048 }
 0x62d   : > { %p1694_p8 = scmp.ne.s32.totalorder %s2097_s7, %s1693_s16  ;;  %p1698_p1 = scmp.lt.u32.totalorder %s2097_s7, %s2150_s2 }
 0x62e   : > { %p1699_p2 = scmp.lt.u32.totalorder %s1697_s25, %s1693_s16  ;;  %p1701_p12 = scmp.lt.u32.totalorder %s1693_s16, %s2097_s7 }
 0x62f   : > { %p1695_p9 = pnand %p1694_p8, %p2166_p13 }
 0x630   : > { %p1700_p11 = por %p1699_p2, %p1698_p1 }
 0x631   : > { %p1696_p10 = pneg %p1695_p9 }
 0x632   : > { %p1702_p7 = por %p1701_p12, %p1700_p11 }
 0x634   : > { %p1703_p3 = pnand %p1702_p7, %p1696_p10 }
 0x636   : > { %1706 = shalt.err (!%p1703_p3)
}
 0x637   : > { %s1756_s23 = smov 128   ;;  %s1757_s19 = smov 8  }
 0x638   : > { %1532 = dma.vmem_to_hbm [thread:$0]  (%p2166_p13), %s2099_s4, 1024, %s2097_s7, %s1239_s13, %s1756_s23, %s1756_s23, %s1757_s19  }
 0x639 PF: > { %s1268_s29 = sand.u32 1, %s1737_s9   ;;  %p2167_p6 = scmp.ne.s32.totalorder %s2157_s22, 0 }
 0x63a   : > { %p2168_p4 = scmp.ge.s32.totalorder %s1749_s12, 2  ;;  %s1269_s30 = scalar_lea.sflag [#allocation4], %s1268_s29 }
 0x63c   : > { %p1543_p5 = pnand %p2168_p4, %p2167_p6 }
 0x63e   : > { %1732 = dma.done.wait (!%p1543_p5), %s1269_s30, 1024  }
 0x63f   : > { %1734 = vsyncadd (!%p1543_p5), %s1269_s30, 4294966272  ;;  %p16_p0 = scmp.ge.s32.totalorder %s1798_s15, 4   ;;  %s2169_s9 = smov %s1741_s10 }
 0x640   : > { %s2170_s10 = smov %s1745_s11  ;;  %s2171_s11 = smov %s1810_s18 }
 0x641   : > { %s2172_s12 = smov %s1798_s15  ;;  %18 = sbr.rel (!%p16_p0) target bundleno = 6 (0x6), region = 84 }
 0x648   :  { %1274 = vsyncpa [#allocation3], 1 }
 0x649   :  { %1276 = vsyncpa [#allocation3 + $0x1], 1 }
 0x64a   :  { %1277 = vsyncpa [#allocation4], 1 }
 0x64b   :  { %1279 = vsyncpa [#allocation4 + $0x1], 1 }
 0x64c   :  { %1280 = vsyncpa [#allocation5], 1 }
 0x64d   :  { %1282 = vsyncpa [#allocation5 + $0x1], 1 }

</bundles_post_ra>
